<compile_context>
chip_gen: v7x
topology: tpu7x:2x2x1
jax: 0.10.0
libtpu: 0.0.40
codegen_flags: <defaults>
</compile_context>

<pallas_src>
import functools

import jax
import jax.numpy as jnp
from jax.experimental import pallas as pl
from jax.experimental.pallas import tpu as pltpu

LEAKY_SLOPE = 0.01   # nn.LeakyReLU default negative_slope
BN_EPS = 1e-5        # nn.BatchNorm2d default eps


def _leaky_relu(v):
    return jnp.where(v >= 0, v, LEAKY_SLOPE * v)


def ssconv_kernel(x_ref, wbig_ref, pwb_ref, dwl_ref, dbl_ref, o_ref, yslab_ref,
                  *, H, W, Cout, K):
    """One batch element per grid step (grid = (N,), TH = H -> no h tiling).

    x_ref    : (1, H, W*Cin)        f32  lane-packed input image
    wbig_ref : (W*Cin, W*Cout)      f32  block-diagonal pointwise weight (BN folded)
    pwb_ref  : (1, W*Cout)          f32  folded BN bias pushed through the 1x1 conv
    dwl_ref  : (K*K, W*Cout)        f32  lane-expanded depthwise taps, W-boundary masked
    dbl_ref  : (1, W*Cout)          f32  lane-expanded depthwise bias
    o_ref    : (1, H, W*Cout)       f32  lane-dense output
    yslab_ref: (H + 2*pad, W*Cout)  f32  VMEM scratch: y with zero halo rows
    """
    pad = K // 2
    Lw = W * Cout

    # ---- pointwise 1x1 conv (BN folded) as one lane-dense block-diagonal matmul ----
    xs = x_ref[0, :, :]                                             # (H, W*Cin)
    y = jnp.dot(xs, wbig_ref[...], preferred_element_type=jnp.float32)
    y = _leaky_relu(y + pwb_ref[...])                               # (H, W*Cout)

    # ---- build the y-space halo slab ----
    # The depthwise conv's zero padding lives in y-space, not x-space (zero input
    # rows would become leaky_relu(pw_bias) != 0 after the pointwise conv).  The pad
    # bands are re-zeroed every step (2*pad rows, negligible) so correctness does not
    # depend on how the "parallel" grid steps are sharded across TensorCores.
    if pad > 0:
        zband = jnp.zeros((pad, Lw), dtype=jnp.float32)
        yslab_ref[0:pad, :] = zband
        yslab_ref[pad + H:pad + H + pad, :] = zband
    yslab_ref[pad:pad + H, :] = y

    # ---- depthwise KxK conv: static row slices (ky) + XLU lane rolls (kx) ----
    # W-boundary masks are pre-folded into dwl (zeroed taps), so no in-kernel mask.
    yslab = yslab_ref[...]                                          # (H+2*pad, W*Cout)
    dwl = dwl_ref[...]                                              # (K*K, W*Cout)
    acc = None
    for ky in range(K):                                             # static -> unrolled
        y_ky = yslab[ky:ky + H, :]                                  # (H, W*Cout)
        for kx in range(K):
            dx = kx - pad
            shift = (-dx * Cout) % Lw
            shifted = pltpu.roll(y_ky, shift, axis=1) if shift else y_ky
            term = shifted * dwl[ky * K + kx]
            acc = term if acc is None else acc + term
    acc = acc + dbl_ref[...]                                        # bias added once
    o_ref[0, :, :] = _leaky_relu(acc)


def ssconv_forward(x_nhwc, gamma, beta, pw_weight, dw_weight, dw_bias):
    """x_nhwc: (N, H, W, Cin); gamma/beta: (Cin,); pw_weight: (Cin, Cout);
    dw_weight: (K, K, Cout); dw_bias: (Cout,).  Returns (N, H, W, Cout)."""
    N, H, W, Cin = x_nhwc.shape
    Cout = pw_weight.shape[1]
    K = dw_weight.shape[0]
    assert K % 2 == 1, "padding=K//2 matches PyTorch 'same' output only for odd K"
    pad = K // 2
    Lw = W * Cout

    x32 = x_nhwc.astype(jnp.float32)

    # ---- Stage 1 (plain XLA): single-pass BN batch stats, folded into the 1x1 conv ----
    cnt = N * H * W
    s1 = jnp.sum(x32, axis=(0, 1, 2))
    s2 = jnp.sum(x32 * x32, axis=(0, 1, 2))
    mean = s1 / cnt
    var = jnp.maximum(s2 / cnt - mean * mean, 0.0)                   # biased variance
    scale = gamma.astype(jnp.float32) * jax.lax.rsqrt(var + BN_EPS)  # (Cin,)
    shift = beta.astype(jnp.float32) - mean * scale                  # (Cin,)
    pw_eff = scale[:, None] * pw_weight.astype(jnp.float32)          # (Cin, Cout)
    pw_bias = shift @ pw_weight.astype(jnp.float32)                  # (Cout,)

    # ---- Static lane-dense parameter re-layout (tiny, trace-time) ----
    # Block-diagonal weight is fine while W*Cin stays small (64 lanes here); for
    # larger W*Cin, pack multiple rows per matmul row instead (full 128 contraction).
    w_big = jnp.kron(jnp.eye(W, dtype=jnp.float32), pw_eff)          # (W*Cin, W*Cout)
    pw_bias_lane = jnp.tile(pw_bias, W).reshape(1, Lw)

    lane = jnp.arange(Lw)
    w_idx = lane // Cout
    o_idx = lane % Cout
    taps = []
    for ky in range(K):
        for kx in range(K):
            dx = kx - pad
            ok = (w_idx + dx >= 0) & (w_idx + dx < W)                # W-boundary mask
            taps.append(jnp.where(ok, dw_weight[ky, kx, o_idx].astype(jnp.float32), 0.0))
    dw_lane = jnp.stack(taps, axis=0)                                # (K*K, W*Cout)
    dw_bias_lane = jnp.tile(dw_bias.astype(jnp.float32), W).reshape(1, Lw)

    # Input -> (N, H, W*Cin) lane-packed.  No H padding: halo rows are built in
    # y-space inside the kernel.
    x_lane = x32.reshape(N, H, W * Cin)

    # VMEM budget: double-buffered ins/outs + resident params + the y-slab scratch.
    fbytes = 4
    x_blk = H * (W * Cin) * fbytes
    o_blk = H * Lw * fbytes
    params = ((W * Cin) * Lw + 2 * Lw + K * K * Lw) * fbytes
    slab = (H + 2 * pad) * Lw * fbytes
    budget = 2 * (x_blk + o_blk + params) + slab
    vmem_limit = int(min(100 * 2 ** 20, max(32 * 2 ** 20, 4 * budget)))

    # TODO(synk): for production-size images on v7x (64 MiB VMEM), switch to
    # (TH + 2*pad)-row halo blocks per grid step instead of a full image per step.
    kernel = functools.partial(ssconv_kernel, H=H, W=W, Cout=Cout, K=K)
    grid_spec = pltpu.PrefetchScalarGridSpec(
        num_scalar_prefetch=0,
        grid=(N,),                        # N >= 2 parallel steps -> both v7x TCs used
        in_specs=[
            pl.BlockSpec((1, H, W * Cin), lambda n: (n, 0, 0)),
            pl.BlockSpec((W * Cin, Lw), lambda n: (0, 0)),
            pl.BlockSpec((1, Lw), lambda n: (0, 0)),
            pl.BlockSpec((K * K, Lw), lambda n: (0, 0)),
            pl.BlockSpec((1, Lw), lambda n: (0, 0)),
        ],
        out_specs=pl.BlockSpec((1, H, Lw), lambda n: (n, 0, 0)),
        scratch_shapes=[pltpu.VMEM((H + 2 * pad, Lw), jnp.float32)],
    )
    out_lane = pl.pallas_call(
        kernel,
        out_shape=jax.ShapeDtypeStruct((N, H, Lw), jnp.float32),
        grid_spec=grid_spec,
        compiler_params=pltpu.CompilerParams(
            dimension_semantics=("parallel",),
            vmem_limit_bytes=vmem_limit,
        ),
    )(x_lane, w_big, pw_bias_lane, dw_lane, dw_bias_lane)

    return out_lane.reshape(N, H, W, Cout)


def ssconv_reference(x_nhwc, gamma, beta, pw_weight, dw_weight, dw_bias):
    """Pure-JAX reference (direct translation of the PyTorch forward)."""
    N, H, W, Cin = x_nhwc.shape
    Cout = pw_weight.shape[1]
    K = dw_weight.shape[0]
    pad = K // 2

    mean = jnp.mean(x_nhwc, axis=(0, 1, 2), keepdims=True)
    var = jnp.mean((x_nhwc - mean) ** 2, axis=(0, 1, 2), keepdims=True)
    xn = (x_nhwc - mean) / jnp.sqrt(var + BN_EPS)
    xn = xn * gamma.reshape(1, 1, 1, Cin) + beta.reshape(1, 1, 1, Cin)

    y = jnp.einsum("nhwc,cd->nhwd", xn, pw_weight)
    y = _leaky_relu(y)

    yp = jnp.pad(y, ((0, 0), (pad, pad), (pad, pad), (0, 0)))
    acc = jnp.broadcast_to(dw_bias.reshape(1, 1, 1, Cout), (N, H, W, Cout))
    for ky in range(K):
        for kx in range(K):
            acc = acc + yp[:, ky:ky + H, kx:kx + W, :] * dw_weight[ky, kx].reshape(1, 1, 1, Cout)
    return _leaky_relu(acc)


if __name__ == "__main__":
    # Small shapes consistent with the module: batch=2, in_ch=4, out_ch=8, 16x16, K=3.
    N, H, W = 2, 16, 16
    in_ch, out_ch, K = 4, 8, 3

    key = jax.random.PRNGKey(0)
    kx, kg, kb, kpw, kdw, kdb = jax.random.split(key, 6)

    # Input as PyTorch would see it (NCHW), converted to the kernel's NHWC layout.
    x_nchw = jax.random.normal(kx, (N, in_ch, H, W), dtype=jnp.float32)
    x_nhwc = jnp.transpose(x_nchw, (0, 2, 3, 1))

    # Parameters (shapes follow the nn.Module):
    #   BN(in_ch): weight/bias (in_ch,)
    #   point_conv: (out_ch, in_ch, 1, 1), bias=False  -> stored as (Cin, Cout)
    #   depth_conv: (out_ch, 1, K, K) + bias (out_ch,) -> stored as (K, K, Cout)
    gamma = 1.0 + 0.1 * jax.random.normal(kg, (in_ch,), dtype=jnp.float32)
    beta = 0.1 * jax.random.normal(kb, (in_ch,), dtype=jnp.float32)
    pw_oi = 0.2 * jax.random.normal(kpw, (out_ch, in_ch), dtype=jnp.float32)
    pw_weight = jnp.transpose(pw_oi, (1, 0))                                  # (Cin, Cout)
    dw_okk = 0.2 * jax.random.normal(kdw, (out_ch, K, K), dtype=jnp.float32)
    dw_weight = jnp.transpose(dw_okk, (1, 2, 0))                              # (K, K, Cout)
    dw_bias = 0.05 * jax.random.normal(kdb, (out_ch,), dtype=jnp.float32)

    out = ssconv_forward(x_nhwc, gamma, beta, pw_weight, dw_weight, dw_bias)
    out = jax.block_until_ready(out)

    ref = ssconv_reference(x_nhwc, gamma, beta, pw_weight, dw_weight, dw_bias)
    assert out.shape == (N, H, W, out_ch)
    assert jnp.allclose(out, ref, atol=1e-4, rtol=1e-4), float(jnp.max(jnp.abs(out - ref)))

    print("KERNEL_OK")
</pallas_src>

<mosaic_0001>
module attributes {stable_mosaic.version = 11 : i64} {
  func.func @ssconv_kernel(%arg0: i32, %arg1: memref<1x16x64xf32, #tpu.memory_space<vmem>>, %arg2: memref<64x128xf32, #tpu.memory_space<vmem>>, %arg3: memref<1x128xf32, #tpu.memory_space<vmem>>, %arg4: memref<9x128xf32, #tpu.memory_space<vmem>>, %arg5: memref<1x128xf32, #tpu.memory_space<vmem>>, %arg6: memref<1x16x128xf32, #tpu.memory_space<vmem>>, %arg7: memref<18x128xf32, #tpu.memory_space<vmem>>) attributes {dimension_semantics = [#tpu.dimension_semantics<parallel>], iteration_bounds = array<i64: 2>, scalar_prefetch = 0 : i64, scratch_operands = 1 : i64, tpu.core_type = #tpu.core_type<tc>, window_params = [{transform_indices = @transform_0, window_bounds = array<i64: 1, 16, 64>}, {pipeline_mode = #tpu.pipeline_mode<synchronous>, transform_indices = @transform_1, window_bounds = array<i64: 64, 128>}, {pipeline_mode = #tpu.pipeline_mode<synchronous>, transform_indices = @transform_2, window_bounds = array<i64: 1, 128>}, {pipeline_mode = #tpu.pipeline_mode<synchronous>, transform_indices = @transform_3, window_bounds = array<i64: 9, 128>}, {pipeline_mode = #tpu.pipeline_mode<synchronous>, transform_indices = @transform_4, window_bounds = array<i64: 1, 128>}, {transform_indices = @transform_5, window_bounds = array<i64: 1, 16, 128>}]} {
    %c0 = arith.constant 0 : index
    %c0_0 = arith.constant 0 : index
    %c0_1 = arith.constant 0 : index
    %0 = vector.load %arg1[%c0, %c0_0, %c0_1] : memref<1x16x64xf32, #tpu.memory_space<vmem>>, vector<1x16x64xf32>
    %1 = vector.shape_cast %0 : vector<1x16x64xf32> to vector<16x64xf32>
    %c0_2 = arith.constant 0 : index
    %c0_3 = arith.constant 0 : index
    %2 = vector.load %arg2[%c0_2, %c0_3] : memref<64x128xf32, #tpu.memory_space<vmem>>, vector<64x128xf32>
    %cst = arith.constant dense<0.000000e+00> : vector<16x128xf32>
    %3 = tpu.matmul %1, %2, %cst {dimension_numbers = #tpu.dot_dimension_numbers<[1], [0], [0], [1], [0, 0, 1, 1], [], []>} : vector<16x64xf32>, vector<64x128xf32>, vector<16x128xf32> -> vector<16x128xf32>
    %c0_4 = arith.constant 0 : index
    %c0_5 = arith.constant 0 : index
    %4 = vector.load %arg3[%c0_4, %c0_5] : memref<1x128xf32, #tpu.memory_space<vmem>>, vector<1x128xf32>
    %5 = vector.broadcast %4 : vector<1x128xf32> to vector<16x128xf32>
    %6 = arith.addf %3, %5 : vector<16x128xf32>
    %cst_6 = arith.constant 0.000000e+00 : f32
    %7 = vector.broadcast %cst_6 : f32 to vector<16x128xf32>
    %8 = arith.cmpf oge, %6, %7 : vector<16x128xf32>
    %cst_7 = arith.constant 0.00999999977 : f32
    %9 = vector.broadcast %cst_7 : f32 to vector<16x128xf32>
    %10 = arith.mulf %9, %6 : vector<16x128xf32>
    %11 = arith.select %8, %6, %10 : vector<16x128xi1>, vector<16x128xf32>
    %cst_8 = arith.constant 0.000000e+00 : f32
    %12 = vector.broadcast %cst_8 : f32 to vector<1x128xf32>
    %c0_9 = arith.constant 0 : index
    %c0_10 = arith.constant 0 : index
    %13 = vector.load %arg7[%c0_9, %c0_10] : memref<18x128xf32, #tpu.memory_space<vmem>>, vector<1x128xf32>
    tpu.vector_store %arg7[%c0_9, %c0_10], %12 {strides = array<i32>} : memref<18x128xf32, #tpu.memory_space<vmem>>, vector<1x128xf32>,
    %c17 = arith.constant 17 : index
    %c0_11 = arith.constant 0 : index
    %14 = vector.load %arg7[%c17, %c0_11] : memref<18x128xf32, #tpu.memory_space<vmem>>, vector<1x128xf32>
    tpu.vector_store %arg7[%c17, %c0_11], %12 {strides = array<i32>} : memref<18x128xf32, #tpu.memory_space<vmem>>, vector<1x128xf32>,
    %c1 = arith.constant 1 : index
    %c0_12 = arith.constant 0 : index
    %15 = vector.load %arg7[%c1, %c0_12] : memref<18x128xf32, #tpu.memory_space<vmem>>, vector<16x128xf32>
    tpu.vector_store %arg7[%c1, %c0_12], %11 {strides = array<i32>} : memref<18x128xf32, #tpu.memory_space<vmem>>, vector<16x128xf32>,
    %c0_13 = arith.constant 0 : index
    %c0_14 = arith.constant 0 : index
    %16 = vector.load %arg7[%c0_13, %c0_14] : memref<18x128xf32, #tpu.memory_space<vmem>>, vector<18x128xf32>
    %c0_15 = arith.constant 0 : index
    %c0_16 = arith.constant 0 : index
    %17 = vector.load %arg4[%c0_15, %c0_16] : memref<9x128xf32, #tpu.memory_space<vmem>>, vector<9x128xf32>
    %18 = vector.extract_strided_slice %16 {offsets = [0, 0], sizes = [16, 128], strides = [1, 1]} : vector<18x128xf32> to vector<16x128xf32>
    %c8_i32 = arith.constant 8 : i32
    %19 = tpu.dynamic_rotate %18 by %c8_i32 dim 1 : vector<16x128xf32>, i32 -> vector<16x128xf32>
    %20 = vector.extract_strided_slice %17 {offsets = [0, 0], sizes = [1, 128], strides = [1, 1]} : vector<9x128xf32> to vector<1x128xf32>
    %21 = vector.shape_cast %20 : vector<1x128xf32> to vector<128xf32>
    %22 = vector.shape_cast %21 : vector<128xf32> to vector<1x128xf32>
    %23 = vector.broadcast %22 : vector<1x128xf32> to vector<16x128xf32>
    %24 = arith.mulf %19, %23 : vector<16x128xf32>
    %25 = vector.extract_strided_slice %17 {offsets = [1, 0], sizes = [1, 128], strides = [1, 1]} : vector<9x128xf32> to vector<1x128xf32>
    %26 = vector.shape_cast %25 : vector<1x128xf32> to vector<128xf32>
    %27 = vector.shape_cast %26 : vector<128xf32> to vector<1x128xf32>
    %28 = vector.broadcast %27 : vector<1x128xf32> to vector<16x128xf32>
    %29 = arith.mulf %18, %28 : vector<16x128xf32>
    %30 = arith.addf %24, %29 : vector<16x128xf32>
    %c120_i32 = arith.constant 120 : i32
    %31 = tpu.dynamic_rotate %18 by %c120_i32 dim 1 : vector<16x128xf32>, i32 -> vector<16x128xf32>
    %32 = vector.extract_strided_slice %17 {offsets = [2, 0], sizes = [1, 128], strides = [1, 1]} : vector<9x128xf32> to vector<1x128xf32>
    %33 = vector.shape_cast %32 : vector<1x128xf32> to vector<128xf32>
    %34 = vector.shape_cast %33 : vector<128xf32> to vector<1x128xf32>
    %35 = vector.broadcast %34 : vector<1x128xf32> to vector<16x128xf32>
    %36 = arith.mulf %31, %35 : vector<16x128xf32>
    %37 = arith.addf %30, %36 : vector<16x128xf32>
    %38 = vector.extract_strided_slice %16 {offsets = [1, 0], sizes = [16, 128], strides = [1, 1]} : vector<18x128xf32> to vector<16x128xf32>
    %c8_i32_17 = arith.constant 8 : i32
    %39 = tpu.dynamic_rotate %38 by %c8_i32_17 dim 1 : vector<16x128xf32>, i32 -> vector<16x128xf32>
    %40 = vector.extract_strided_slice %17 {offsets = [3, 0], sizes = [1, 128], strides = [1, 1]} : vector<9x128xf32> to vector<1x128xf32>
    %41 = vector.shape_cast %40 : vector<1x128xf32> to vector<128xf32>
    %42 = vector.shape_cast %41 : vector<128xf32> to vector<1x128xf32>
    %43 = vector.broadcast %42 : vector<1x128xf32> to vector<16x128xf32>
    %44 = arith.mulf %39, %43 : vector<16x128xf32>
    %45 = arith.addf %37, %44 : vector<16x128xf32>
    %46 = vector.extract_strided_slice %17 {offsets = [4, 0], sizes = [1, 128], strides = [1, 1]} : vector<9x128xf32> to vector<1x128xf32>
    %47 = vector.shape_cast %46 : vector<1x128xf32> to vector<128xf32>
    %48 = vector.shape_cast %47 : vector<128xf32> to vector<1x128xf32>
    %49 = vector.broadcast %48 : vector<1x128xf32> to vector<16x128xf32>
    %50 = arith.mulf %38, %49 : vector<16x128xf32>
    %51 = arith.addf %45, %50 : vector<16x128xf32>
    %c120_i32_18 = arith.constant 120 : i32
    %52 = tpu.dynamic_rotate %38 by %c120_i32_18 dim 1 : vector<16x128xf32>, i32 -> vector<16x128xf32>
    %53 = vector.extract_strided_slice %17 {offsets = [5, 0], sizes = [1, 128], strides = [1, 1]} : vector<9x128xf32> to vector<1x128xf32>
    %54 = vector.shape_cast %53 : vector<1x128xf32> to vector<128xf32>
    %55 = vector.shape_cast %54 : vector<128xf32> to vector<1x128xf32>
    %56 = vector.broadcast %55 : vector<1x128xf32> to vector<16x128xf32>
    %57 = arith.mulf %52, %56 : vector<16x128xf32>
    %58 = arith.addf %51, %57 : vector<16x128xf32>
    %59 = vector.extract_strided_slice %16 {offsets = [2, 0], sizes = [16, 128], strides = [1, 1]} : vector<18x128xf32> to vector<16x128xf32>
    %c8_i32_19 = arith.constant 8 : i32
    %60 = tpu.dynamic_rotate %59 by %c8_i32_19 dim 1 : vector<16x128xf32>, i32 -> vector<16x128xf32>
    %61 = vector.extract_strided_slice %17 {offsets = [6, 0], sizes = [1, 128], strides = [1, 1]} : vector<9x128xf32> to vector<1x128xf32>
    %62 = vector.shape_cast %61 : vector<1x128xf32> to vector<128xf32>
    %63 = vector.shape_cast %62 : vector<128xf32> to vector<1x128xf32>
    %64 = vector.broadcast %63 : vector<1x128xf32> to vector<16x128xf32>
    %65 = arith.mulf %60, %64 : vector<16x128xf32>
    %66 = arith.addf %58, %65 : vector<16x128xf32>
    %67 = vector.extract_strided_slice %17 {offsets = [7, 0], sizes = [1, 128], strides = [1, 1]} : vector<9x128xf32> to vector<1x128xf32>
    %68 = vector.shape_cast %67 : vector<1x128xf32> to vector<128xf32>
    %69 = vector.shape_cast %68 : vector<128xf32> to vector<1x128xf32>
    %70 = vector.broadcast %69 : vector<1x128xf32> to vector<16x128xf32>
    %71 = arith.mulf %59, %70 : vector<16x128xf32>
    %72 = arith.addf %66, %71 : vector<16x128xf32>
    %c120_i32_20 = arith.constant 120 : i32
    %73 = tpu.dynamic_rotate %59 by %c120_i32_20 dim 1 : vector<16x128xf32>, i32 -> vector<16x128xf32>
    %74 = vector.extract_strided_slice %17 {offsets = [8, 0], sizes = [1, 128], strides = [1, 1]} : vector<9x128xf32> to vector<1x128xf32>
    %75 = vector.shape_cast %74 : vector<1x128xf32> to vector<128xf32>
    %76 = vector.shape_cast %75 : vector<128xf32> to vector<1x128xf32>
    %77 = vector.broadcast %76 : vector<1x128xf32> to vector<16x128xf32>
    %78 = arith.mulf %73, %77 : vector<16x128xf32>
    %79 = arith.addf %72, %78 : vector<16x128xf32>
    %c0_21 = arith.constant 0 : index
    %c0_22 = arith.constant 0 : index
    %80 = vector.load %arg5[%c0_21, %c0_22] : memref<1x128xf32, #tpu.memory_space<vmem>>, vector<1x128xf32>
    %81 = vector.broadcast %80 : vector<1x128xf32> to vector<16x128xf32>
    %82 = arith.addf %79, %81 : vector<16x128xf32>
    %cst_23 = arith.constant 0.000000e+00 : f32
    %83 = vector.broadcast %cst_23 : f32 to vector<16x128xf32>
    %84 = arith.cmpf oge, %82, %83 : vector<16x128xf32>
    %cst_24 = arith.constant 0.00999999977 : f32
    %85 = vector.broadcast %cst_24 : f32 to vector<16x128xf32>
    %86 = arith.mulf %85, %82 : vector<16x128xf32>
    %87 = arith.select %84, %82, %86 : vector<16x128xi1>, vector<16x128xf32>
    %c0_25 = arith.constant 0 : index
    %c0_26 = arith.constant 0 : index
    %c0_27 = arith.constant 0 : index
    %88 = vector.load %arg6[%c0_25, %c0_26, %c0_27] : memref<1x16x128xf32, #tpu.memory_space<vmem>>, vector<1x16x128xf32>
    %89 = vector.shape_cast %88 : vector<1x16x128xf32> to vector<16x128xf32>
    %90 = vector.shape_cast %87 : vector<16x128xf32> to vector<1x16x128xf32>
    tpu.vector_store %arg6[%c0_25, %c0_26, %c0_27], %90 {strides = array<i32>} : memref<1x16x128xf32, #tpu.memory_space<vmem>>, vector<1x16x128xf32>,
    return
  }
  func.func @transform_0(%arg0: i32) -> (i32, i32, i32) {
    %c0_i32 = arith.constant 0 : i32
    %c0_i32_0 = arith.constant 0 : i32
    %c0_i32_1 = arith.constant 0 : i32
    return %arg0, %c0_i32, %c0_i32_0 : i32, i32, i32
  }
  func.func @transform_1(%arg0: i32) -> (i32, i32) {
    %c0_i32 = arith.constant 0 : i32
    %c0_i32_0 = arith.constant 0 : i32
    %c0_i32_1 = arith.constant 0 : i32
    return %c0_i32, %c0_i32_0 : i32, i32
  }
  func.func @transform_2(%arg0: i32) -> (i32, i32) {
    %c0_i32 = arith.constant 0 : i32
    %c0_i32_0 = arith.constant 0 : i32
    %c0_i32_1 = arith.constant 0 : i32
    return %c0_i32, %c0_i32_0 : i32, i32
  }
  func.func @transform_3(%arg0: i32) -> (i32, i32) {
    %c0_i32 = arith.constant 0 : i32
    %c0_i32_0 = arith.constant 0 : i32
    %c0_i32_1 = arith.constant 0 : i32
    return %c0_i32, %c0_i32_0 : i32, i32
  }
  func.func @transform_4(%arg0: i32) -> (i32, i32) {
    %c0_i32 = arith.constant 0 : i32
    %c0_i32_0 = arith.constant 0 : i32
    %c0_i32_1 = arith.constant 0 : i32
    return %c0_i32, %c0_i32_0 : i32, i32
  }
  func.func @transform_5(%arg0: i32) -> (i32, i32, i32) {
    %c0_i32 = arith.constant 0 : i32
    %c0_i32_0 = arith.constant 0 : i32
    %c0_i32_1 = arith.constant 0 : i32
    return %arg0, %c0_i32, %c0_i32_0 : i32, i32, i32
  }
}

</mosaic_0001>

<bundles_post_ra>
// kernel: tpu_custom_call.1
= control target key start
LH: loop header
LB: loop body
LE: loop exit
PB: predicated region body
PF: predicated region fallthrough
CT: control target
= control target key end

     0   :  { %10 = vsyncpa [#allocation4], 0  ;;  %s1279_s0 = inlined_call_operand.hbm [shape: f32[2,16,64], index: 0, kind: input, shape index: {}]   ;;  %s1280_s1 = inlined_call_operand.hbm [shape: f32[64,128], index: 1, kind: input, shape index: {}]   ;;  %s1281_s2 = inlined_call_operand.vmem [shape: f32[1,128], index: 2, kind: input, shape index: {}]   ;;  %s1282_s3 = inlined_call_operand.hbm [shape: f32[9,128], index: 3, kind: input, shape index: {}]   ;;  %s1283_s4 = inlined_call_operand.vmem [shape: f32[1,128], index: 4, kind: input, shape index: {}]   ;;  %s1284_s5 = inlined_call_operand.hbm [shape: f32[2,16,128], index: 5, kind: output, shape index: {}]  }
   0x1   :  { %12 = vsyncpa [#allocation4 + $0x1], 0 }
   0x2   :  { %13 = vsyncpa [#allocation7], 0 }
   0x3   :  { %14 = vsyncpa [#allocation5], 0 }
   0x4   :  { %16 = vsyncpa [#allocation5 + $0x1], 0  ;;  %s985_s18 = smov 0   ;;  %s987_s19 = smov 0  }
   0x5   :  { %s989_s20 = smov 0   ;;  %s991_s21 = smov 0  }
   0x6 LB: > { %s1006_s22 = sadd.s32 4294967295, %s943_s21   ;;  %s644_s23 = sadd.s32 4294967294, %s943_s21   ;;  %s943_s21 = sphi %s991_s21, %s1304_s21   ;;  %s939_s20 = sphi %s989_s20, %s1303_s20   ;;  %s935_s19 = sphi %s987_s19, %s1302_s19   ;;  %s931_s18 = sphi %s985_s18, %s1301_s18  }
   0x7   : > { %p42_p0 = scmp.ne.s32.totalorder %s935_s19, %s931_s18  ;;  %p1285_p1 = scmp.eq.s32.totalorder %s1006_s22, 0 }
   0x8   : > { %p156_p3 = scmp.eq.s32.totalorder %s644_s23, 1  ;;  %p645_p5 = scmp.ge.s32.totalorder %s943_s21, 1 }
   0x9   : > { %p1015_p4 = por %p1285_p1, %p42_p0  ;;  %p163_p7 = scmp.lt.s32.totalorder %s943_s21, 3 }
   0xa   : > { %p1020_p6 = por %p156_p3, %p42_p0  ;;  %s945_s27 = smov [#allocation6]  }
   0xb   : > { %s1288_s24 = scalar_select %p1015_p4, 1, 0 }
   0xc   : > { %s1289_s25 = scalar_select %p1020_p6, 1, 0 }
   0xd   : > { %p1025_p8 = pnand %p645_p5, %p163_p7  ;;  %s175_s28 = sshll.u32 %s945_s27, 4  ;;  %s1029_s28 = int_to_ptr.vmem [resolvable:$true] %s175_s28 }
   0xe   : > { %s946_s30 = smov [#allocation8]   ;;  %s787_s9 = scalar_lea.hbm %s1280_s1, 1024 }
   0xf   : > { %p726_p9 = pneg %p1025_p8  ;;  %s191_s6 = sshll.u32 %s946_s30, 4  ;;  %s1040_s6 = int_to_ptr.vmem [resolvable:$true] %s191_s6 }
  0x10   : > { %p788_p12 = scmp.ne.s32.totalorder %s1280_s1, %s787_s9  ;;  %p794_p5 = scmp.lt.u32.totalorder %s787_s9, %s1280_s1 }
  0x11   : > { %p1036_p11 = pnand %p726_p9, %p1285_p1 }
  0x13   : > { %p789_p13 = pneg %p1036_p11 }
  0x15   : > { %p790_p0 = pnand %p789_p13, %p788_p12 }
  0x17   : > { %p791_p3 = pneg %p790_p0 }
  0x19   : > { %p796_p7 = pnand %p794_p5, %p791_p3 }
  0x1b   : > { %799 = shalt.err (!%p796_p7)
}
  0x1c   : > { %s800_s14 = scalar_lea.vmem %s1029_s28, 1024  ;;  %p808_p2 = scmp.lt.s32.totalorder %s1029_s28, %s1029_s28 }
  0x1d   : > { %p801_p9 = scmp.ne.s32.totalorder %s1029_s28, %s800_s14  ;;  %p809_p12 = scmp.lt.s32.totalorder %s800_s14, %s800_s14 }
  0x1f   : > { %p803_p10 = pnand %p801_p9, %p789_p13  ;;  %p810_p0 = por %p809_p12, %p808_p2 }
  0x21   : > { %p804_p1 = pneg %p803_p10 }
  0x23   : > { %p811_p6 = pnand %p810_p0, %p804_p1 }
  0x25   : > { %814 = shalt.err (!%p811_p6)
}
  0x26   : > { %s947_s15 = smov 128   ;;  %s948_s16 = smov 8  }
  0x27   : > { %729 = dma.hbm_to_vmem [thread:$0]  (!%p1036_p11), %s1280_s1, 1024, %s1029_s28, [#allocation7], %s947_s15, %s947_s15, %s948_s16  }
  0x28   : > { %s815_s7 = scalar_lea.hbm %s1282_s3, 256 }
  0x29   : > { %p816_p1 = scmp.ne.s32.totalorder %s1282_s3, %s815_s7  ;;  %p822_p10 = scmp.lt.u32.totalorder %s815_s7, %s1282_s3 }
  0x2b   : > { %p818_p2 = pnand %p816_p1, %p789_p13 }
  0x2d   : > { %p819_p6 = pneg %p818_p2 }
  0x2f   : > { %p824_p3 = pnand %p822_p10, %p819_p6 }
  0x31   : > { %827 = shalt.err (!%p824_p3)
}
  0x32   : > { %s828_s28 = scalar_lea.vmem %s1040_s6, 256  ;;  %p836_p12 = scmp.lt.s32.totalorder %s1040_s6, %s1040_s6 }
  0x33   : > { %p829_p5 = scmp.ne.s32.totalorder %s1040_s6, %s828_s28  ;;  %p837_p0 = scmp.lt.s32.totalorder %s828_s28, %s828_s28 }
  0x35   : > { %p831_p7 = pnand %p829_p5, %p789_p13  ;;  %p838_p1 = por %p837_p0, %p836_p12 }
  0x37   : > { %p832_p9 = pneg %p831_p7 }
  0x39   : > { %p839_p2 = pnand %p838_p1, %p832_p9 }
  0x3b   : > { %842 = shalt.err (!%p839_p2)
}
  0x3c   : > { %732 = dma.hbm_to_vmem [thread:$0]  (!%p1036_p11), %s1282_s3, 256, %s1040_s6, [#allocation7], %s947_s15, %s947_s15, %s948_s16  }
  0x3d   : > { %s1101_s29 = sadd.s32 1, %s943_s21   ;;  %s29_s14 = sadd.s32 1, %s939_s20 }
  0x3e   : > { %s26_s17 = ssub.s32 %s943_s21, %s1101_s29  ;;  %p36_p13 = scmp.ne.s32.totalorder %s939_s20, %s935_s19 }
  0x3f   : > { %p27_p6 = scmp.eq.s32.totalorder %s26_s17, 0  ;;  %p37_p10 = scmp.eq.s32.totalorder %s943_s21, 0 }
  0x40   : > { %p1292_p3 = scmp.eq.s32.totalorder %s1006_s22, 1  ;;  %p743_p7 = scmp.lt.s32.totalorder %s943_s21, 2 }
  0x41   : > { %s1117_s27 = scalar_select %p27_p6, %s939_s20, %s29_s14  }
  0x42   : > { %p1111_p5 = por %p1292_p3, %p36_p13  ;;  %p38_p9 = por %p37_p10, %p36_p13 }
  0x43   : > { %s208_s30 = sand.u32 1, %s939_s20   ;;  %s667_s6 = sshll.u32 %s943_s21, 8 }
  0x44   : > { %s1293_s23 = scalar_select %p1111_p5, 1, 0 }
  0x45   : > { %s649_s7 = sshll.u32 %s208_s30, 4  ;;  %s1124_s10 = scalar_lea.hbm %s1279_s0, %s667_s6 }
  0x46   : > { %s212_s11 = scalar_lea.vmem [#allocation3], %s649_s7  ;;  %p1128_p11 = pnand %p743_p7, %p38_p9 }
  0x47   : > { %s219_s28 = sshll.u32 %s212_s11, 4  ;;  %s1132_s13 = scalar_lea.sflag [#allocation4], %s208_s30  ;;  %s1126_s28 = int_to_ptr.vmem [resolvable:$true] %s219_s28 }
  0x48   : > { %s843_s14 = scalar_lea.hbm %s1124_s10, 256  ;;  %p845_p0 = pneg %p1128_p11 }
  0x49   : > { %p844_p12 = scmp.ne.s32.totalorder %s1124_s10, %s843_s14  ;;  %s848_s6 = scalar_lea.hbm %s1279_s0, 512 }
  0x4a   : > { %p849_p13 = scmp.lt.u32.totalorder %s1124_s10, %s1279_s0  ;;  %p850_p6 = scmp.lt.u32.totalorder %s848_s6, %s843_s14 }
  0x4b   : > { %p846_p1 = pnand %p845_p0, %p844_p12  ;;  %p852_p3 = scmp.lt.u32.totalorder %s843_s14, %s1124_s10 }
  0x4c   : > { %p851_p10 = por %p850_p6, %p849_p13 }
  0x4d   : > { %p847_p2 = pneg %p846_p1 }
  0x4e   : > { %p853_p7 = por %p852_p3, %p851_p10 }
  0x50   : > { %p854_p9 = pnand %p853_p7, %p847_p2 }
  0x52   : > { %857 = shalt.err (!%p854_p9)
}
  0x53   : > { %s858_s30 = scalar_lea.vmem %s1126_s28, 256  ;;  %s949_s11 = smov [#allocation3]  }
  0x54   : > { %p859_p12 = scmp.ne.s32.totalorder %s1126_s28, %s858_s30  ;;  %s863_s17 = sshll.u32 %s949_s11, 4  ;;  %s864_s17 = int_to_ptr.vmem [resolvable:$false] %s863_s17 }
  0x55   : > { %s865_s7 = scalar_lea.vmem %s864_s17, 512  ;;  %p866_p4 = scmp.lt.s32.totalorder %s1126_s28, %s864_s17 }
  0x56   : > { %p861_p1 = pnand %p859_p12, %p845_p0  ;;  %p867_p13 = scmp.lt.s32.totalorder %s865_s7, %s858_s30 }
  0x58   : > { %p862_p5 = pneg %p861_p1  ;;  %p868_p6 = por %p867_p13, %p866_p4 }
  0x5a   : > { %p869_p10 = pnand %p868_p6, %p862_p5 }
  0x5c   : > { %872 = shalt.err (!%p869_p10)
}
  0x5d   : > { %736 = dma.hbm_to_vmem [thread:$0]  (!%p1128_p11), %s1124_s10, 256, %s1126_s28, %s1132_s13, %s947_s15, %s947_s15, %s948_s16  }
  0x5e   : > { %231 = sbr.rel (%p1025_p8) target bundleno = 509 (0x1fd), region = 40  ;;  %s1166_s14 = sand.u32 (!%p1025_p8), 1, %s935_s19  }
  0x5f   : > { %s653_s6 = sshll.u32 (!%p1025_p8), %s1166_s14, 4  ;;  %s234_s8 = scalar_lea.sflag (!%p1025_p8), [#allocation4], %s1166_s14 }
  0x60   : > { %s237_s12 = scalar_lea.vmem (!%p1025_p8), [#allocation3], %s653_s6  ;;  %p1295_p4 = scmp.ne.s32.totalorder (!%p1025_p8), %s1288_s24, 0 }
  0x65   : > { %918 = dma.done.wait (%p1295_p4), %s234_s8, 256  }
  0x66   : > { %920 = vsyncadd (%p1295_p4), %s234_s8, 4294967040  ;;  %p1296_p5 = scmp.eq.s32.totalorder %s1006_s22, 0 }
  0x68   : > { %922 = dma.done.wait (%p1296_p5), [#allocation7], 1280   ;;  %p1297_p8 = pmov %p1296_p5 }
  0x69   : > { %v274_v0 = vld [vmem:[#allocation6] sm:$0xff]  ;;  %v275_v1 = vld [vmem:[#allocation6 + $0x8] sm:$0xff]  ;;  %v276_v2 = vld [vmem:[#allocation6 + $0x10] sm:$0xff]  ;;  %vm289_vm0 = vcmask 523264   ;;  %v950_v14 = vmov 0.0   ;;  %v390_v16 = vlaneseq  ;;  %s951_s15 = smov 120  }
  0x6a   : > { %924 = vsyncadd (%p1297_p8), [#allocation7], 4294966016  ;;  %v698_v3 = vpack.c.bf16 %v275_v1, %v274_v0  ;;  %v277_v4 = vld [vmem:[#allocation6 + $0x18] sm:$0xff]  ;;  %v278_v6 = vld [vmem:[#allocation6 + $0x20] sm:$0xff]  ;;  %377 = vst [vmem:[#allocation2] sm:$0x1] %v950_v14 }
  0x6b   : > { %v702_v5 = vpack.c.bf16 %v277_v4, %v276_v2  ;;  %v279_v7 = vld [vmem:[#allocation6 + $0x28] sm:$0xff]  ;;  %v272_v8 = vld [vmem:[%s237_s12] sm:$0xff]  ;;  %v281_v11 = vld [vmem:[#allocation6 + $0x38] sm:$0xff]  ;;  %378 = vst [vmem:[#allocation2 + $0x11] sm:$0x1] %v950_v14  ;;  %v1185_v21 = vshrl.u32 %v390_v16, 7 }
  0x6c   : > { %699 = vmatprep.subr.bf16.mxu0 %v698_v3  ;;  %695 = vmatprep.mubr.msk.f32.mxu0 %vm289_vm0, %v272_v8  ;;  %v706_v9 = vpack.c.bf16 %v279_v7, %v278_v6  ;;  %v280_v10 = vld [vmem:[#allocation6 + $0x30] sm:$0xff]  ;;  %v273_v13 = vld [vmem:[%s237_s12 + $0x8] sm:$0xff]  ;;  %v1188_v27 = vld [vmem:[#allocation8] sm:$0xff]  ;;  %s952_s16 = smov 8   ;;  %vm419_vm3 = vcmask 1046528   ;;  %vm470_vm4 = vcmask 1045504  }
  0x6d   : > { %701 = vmatpush3.bf16.msra.mxu0 %v698_v3  ;;  %v710_v12 = vpack.c.bf16 %v281_v11, %v280_v10  ;;  %v657_v15 = vld [vmem:[%s1281_s2] ss:$0 sm:$0xff]  ;;  %v441_v26 = vsub.s32 4, %v1185_v21  ;;  %v492_v28 = vsub.s32 7, %v1185_v21  ;;  %v392_v60 = vsub.s32 0, %v1185_v21  ;;  %s668_s13 = sshll.u32 %s1006_s22, 8 }
  0x6e   : > { %703 = vmatprep.subr.bf16.mxu0 %v702_v5  ;;  %v398_v61 = vsub.s32 1, %v1185_v21  ;;  %v410_v63 = vsub.s32 2, %v1185_v21  ;;  %v433_v4 = vsub.s32 3, %v1185_v21  ;;  %s271_s9 = scalar_lea.vmem [#allocation9], %s653_s6  ;;  %s1232_s7 = scalar_lea.hbm %s1284_s5, %s668_s13 }
  0x6f   : > { %v442_v29 = vrot.slane %v1188_v27, %v441_v26  ;;  %v493_v30 = vrot.slane %v1188_v27, %v492_v28  ;;  %v393_v62 = vrot.slane %v1188_v27, %v392_v60  ;;  %s552_s30 = sshll.u32 %s271_s9, 4  ;;  %s539_s22 = scalar_lea.sflag [#allocation5], %s1166_s14  ;;  %s1234_s30 = int_to_ptr.vmem [resolvable:$true] %s552_s30 }
  0x70   : > { %v399_v0 = vrot.slane %v1188_v27, %v398_v61  ;;  %s873_s6 = scalar_lea.vmem %s1234_s30, 256  ;;  %p1298_p0 = scmp.ne.s32.totalorder %s1293_s23, 0 }
  0x71   : > { %705 = vmatpush3.bf16.msra.mxu0 %v702_v5  ;;  %v411_v5 = vrot.slane %v1188_v27, %v410_v63  ;;  %p874_p11 = scmp.ne.s32.totalorder %s1234_s30, %s873_s6  ;;  %s953_s8 = smov [#allocation9]  }
  0x72   : > { %707 = vmatprep.subr.bf16.mxu0 %v706_v9  ;;  %s877_s12 = sshll.u32 %s953_s8, 4  ;;  %s878_s12 = int_to_ptr.vmem [resolvable:$false] %s877_s12 }
  0x73   : > { %p875_p2 = pnand %p874_p11, %p1298_p0  ;;  %s879_s24 = scalar_lea.vmem %s878_s12, 512 }
  0x74   : > { %p880_p7 = scmp.lt.s32.totalorder %s1234_s30, %s878_s12  ;;  %p881_p9 = scmp.lt.s32.totalorder %s879_s24, %s873_s6 }
  0x75   : > { %709 = vmatpush3.bf16.msra.mxu0 %v706_v9  ;;  %v464_v9 = vsub.s32 5, %v1185_v21  ;;  %p876_p3 = pneg %p875_p2 }
  0x76   : > { %711 = vmatprep.subr.bf16.mxu0 %v710_v12  ;;  %p882_p12 = por %p881_p9, %p880_p7 }
  0x78   : > { %p883_p1 = pnand %p882_p12, %p876_p3 }
  0x79   : > { %713 = vmatpush3.bf16.msra.mxu0 %v710_v12 }
  0x7c   : > { %696 = vmatmul.mubr.msk.f32.vlgmr.msra.gmra.mrb[0].mxu0 %vm289_vm0, %v273_v13  ;;  %v434_v13 = vrot.slane %v1188_v27, %v433_v4 }
 0x14f   : > { %v697_v17 = vpop.f32.mrb[0].mxu0 }
 0x150   : > { %v368_v18 = vadd.f32 %v697_v17, %v657_v15  ;;  %v362_v19 = vpop.f32.mrb[1].mxu0 }
 0x151   : > { %v363_v20 = vadd.f32 %v657_v15, %v362_v19  ;;  %v465_v19 = vrot.slane %v1188_v27, %v464_v9 }
 0x152   : > { %vm372_vm1 = vcmp.ge.f32.partialorder %v368_v18, 0.0  ;;  %v374_v22 = vmul.f32 0.01, %v368_v18 }
 0x153   : > { %vm371_vm2 = vcmp.ge.f32.partialorder %v363_v20, 0.0  ;;  %v373_v23 = vmul.f32 0.01, %v363_v20 }
 0x154   : > { %v376_v24 = vsel %vm372_vm1, %v368_v18, %v374_v22 }
 0x155   : > { %380 = vst [vmem:[#allocation2 + $0x9] sm:$0xff] %v376_v24  ;;  %v375_v25 = vsel %vm371_vm2, %v363_v20, %v373_v23  ;;  %v484_v20 = vsub.s32 6, %v1185_v21 }
 0x156   : > { %379 = vst [vmem:[#allocation2 + $0x1] sm:$0xff] %v375_v25 }
 0x15c   : > { %v383_v31 = vld [vmem:[#allocation2 + $0x10] sm:$0x3] }
 0x15d   : > { %v381_v32 = vld [vmem:[#allocation2] sm:$0xff]  ;;  %v382_v33 = vld [vmem:[#allocation2 + $0x8] sm:$0xff]  ;;  %v445_v34 = vmul.f32 %v442_v29, %v383_v31  ;;  %v496_v35 = vmul.f32 %v493_v30, %v383_v31  ;;  %v423_v39 = vrot.slane %v383_v31, 1  ;;  %v474_v56 = vrot.slane %v383_v31, 2 }
 0x15e   : > { %404 = vrot.lane.b32.xlu1 %v381_v32, %s951_s15  ;;  %386 = vrot.lane.b32.xlu0 %v381_v32, %s952_s16  ;;  %v444_v36 = vmul.f32 %v442_v29, %v382_v33  ;;  %v421_v38 = vrot.slane %v382_v33, 1  ;;  %v420_v40 = vrot.slane %v381_v32, 1  ;;  %v443_v42 = vmul.f32 %v442_v29, %v381_v32 }
 0x15f   : > { %v452_v37 = vrot.slane %v445_v34, 1  ;;  %v495_v43 = vmul.f32 %v493_v30, %v382_v33  ;;  %v503_v44 = vrot.slane %v496_v35, 2  ;;  %v494_v45 = vmul.f32 %v493_v30, %v381_v32 }
 0x160   : > { %v450_v41 = vrot.slane %v444_v36, 1  ;;  %v449_v47 = vrot.slane %v443_v42, 1  ;;  %v424_v50 = vsel %vm419_vm3, %v421_v38, %v423_v39  ;;  %v422_v51 = vsel %vm419_vm3, %v420_v40, %v421_v38 }
 0x161   : > { %v501_v48 = vrot.slane %v495_v43, 2  ;;  %v500_v49 = vrot.slane %v494_v45, 2  ;;  %v472_v55 = vrot.slane %v382_v33, 2  ;;  %v471_v57 = vrot.slane %v381_v32, 2 }
 0x162   : > { %406 = vrot.lane.b32.xlu1 %v382_v33, %s951_s15  ;;  %388 = vrot.lane.b32.xlu0 %v382_v33, %s952_s16  ;;  %v453_v46 = vsel %vm419_vm3, %v450_v41, %v452_v37  ;;  %v451_v52 = vsel %vm419_vm3, %v449_v47, %v450_v41  ;;  %v400_v6 = vmul.f32 %v399_v0, %v381_v32  ;;  %v660_v41 = vld [vmem:[#allocation8 + $0x8] ss:$0 sm:$0xff] }
 0x163   : > { %v1197_v53 = vsel %vm470_vm4, %v501_v48, %v503_v44  ;;  %v1201_v54 = vsel %vm470_vm4, %v500_v49, %v501_v48  ;;  %v475_v58 = vsel %vm470_vm4, %v472_v55, %v474_v56  ;;  %v473_v59 = vsel %vm470_vm4, %v471_v57, %v472_v55  ;;  %v661_v49 = vld [vmem:[%s1283_s4] ss:$0 sm:$0xff] }
 0x164   : > { %v401_v11 = vmul.f32 %v399_v0, %v382_v33  ;;  %v485_v31 = vrot.slane %v1188_v27, %v484_v20 }
 0x166   : > { %429 = vrot.lane.b32.xlu1 %v424_v50, %s952_s16  ;;  %427 = vrot.lane.b32.xlu0 %v422_v51, %s952_s16 }
 0x16a   : > { %460 = vrot.lane.b32.xlu1 %v424_v50, %s951_s15  ;;  %458 = vrot.lane.b32.xlu0 %v422_v51, %s951_s15 }
 0x16e   : > { %480 = vrot.lane.b32.xlu1 %v475_v58, %s952_s16  ;;  %478 = vrot.lane.b32.xlu0 %v473_v59, %s952_s16 }
 0x172   : > { %511 = vrot.lane.b32.xlu1 %v475_v58, %s951_s15  ;;  %509 = vrot.lane.b32.xlu0 %v473_v59, %s951_s15 }
 0x1d0   : > { %v405_v1 = vpop.permute.xlu1 %404  ;;  %v387_v2 = vpop.permute.xlu0 %386 }
 0x1d1   : > { %v394_v3 = vmul.f32 %v393_v62, %v387_v2  ;;  %v412_v14 = vmul.f32 %v411_v5, %v405_v1 }
 0x1d3   : > { %v402_v10 = vadd.f32 %v400_v6, %v394_v3 }
 0x1d4   : > { %v407_v7 = vpop.permute.xlu1 %406  ;;  %v389_v8 = vpop.permute.xlu0 %388 }
 0x1d5   : > { %v395_v12 = vmul.f32 %v393_v62, %v389_v8  ;;  %v413_v15 = vmul.f32 %v411_v5, %v407_v7  ;;  %v414_v24 = vadd.f32 %v412_v14, %v402_v10 }
 0x1d7   : > { %v403_v16 = vadd.f32 %v401_v11, %v395_v12 }
 0x1d8   : > { %v430_v17 = vpop.permute.xlu1 %429  ;;  %v428_v18 = vpop.permute.xlu0 %427 }
 0x1d9   : > { %v415_v22 = vadd.f32 %v413_v15, %v403_v16  ;;  %v436_v23 = vmul.f32 %v434_v13, %v430_v17  ;;  %v435_v25 = vmul.f32 %v434_v13, %v428_v18 }
 0x1db   : > { %v438_v26 = vadd.f32 %v436_v23, %v415_v22  ;;  %v437_v28 = vadd.f32 %v435_v25, %v414_v24 }
 0x1dc   : > { %v461_v29 = vpop.permute.xlu1 %460  ;;  %v459_v30 = vpop.permute.xlu0 %458 }
 0x1dd   : > { %v457_v32 = vadd.f32 %v453_v46, %v438_v26  ;;  %v467_v33 = vmul.f32 %v465_v19, %v461_v29  ;;  %v456_v34 = vadd.f32 %v451_v52, %v437_v28  ;;  %v466_v35 = vmul.f32 %v465_v19, %v459_v30 }
 0x1df   : > { %v469_v38 = vadd.f32 %v467_v33, %v457_v32  ;;  %v468_v39 = vadd.f32 %v466_v35, %v456_v34 }
 0x1e0   : > { %v481_v36 = vpop.permute.xlu1 %480  ;;  %v479_v37 = vpop.permute.xlu0 %478 }
 0x1e1   : > { %v487_v21 = vmul.f32 %v485_v31, %v481_v36  ;;  %v486_v40 = vmul.f32 %v485_v31, %v479_v37 }
 0x1e3   : > { %v489_v42 = vadd.f32 %v487_v21, %v469_v38  ;;  %v488_v43 = vadd.f32 %v486_v40, %v468_v39 }
 0x1e4   : > { %v512_v44 = vpop.permute.xlu1 %511  ;;  %v510_v45 = vpop.permute.xlu0 %509 }
 0x1e5   : > { %v508_v47 = vadd.f32 %v1197_v53, %v489_v42  ;;  %v518_v27 = vmul.f32 %v660_v41, %v512_v44  ;;  %v507_v46 = vadd.f32 %v1201_v54, %v488_v43  ;;  %v517_v48 = vmul.f32 %v660_v41, %v510_v45 }
 0x1e7   : > { %v520_v50 = vadd.f32 %v518_v27, %v508_v47  ;;  %v519_v51 = vadd.f32 %v517_v48, %v507_v46 }
 0x1e9   : > { %v529_v52 = vadd.f32 %v661_v49, %v520_v50  ;;  %v528_v55 = vadd.f32 %v661_v49, %v519_v51 }
 0x1eb   : > { %vm531_vm5 = vcmp.ge.f32.partialorder %v529_v52, 0.0  ;;  %v533_v53 = vmul.f32 0.01, %v529_v52  ;;  %vm530_vm6 = vcmp.ge.f32.partialorder %v528_v55, 0.0  ;;  %v532_v56 = vmul.f32 0.01, %v528_v55 }
 0x1ed   : > { %v535_v54 = vsel %vm531_vm5, %v529_v52, %v533_v53  ;;  %v534_v57 = vsel %vm530_vm6, %v528_v55, %v532_v56 }
 0x1ee   : > { %537 = vst [vmem:[%s271_s9 + $0x8] sm:$0xff] %v535_v54  ;;  %536 = vst [vmem:[%s271_s9] sm:$0xff] %v534_v57 }
 0x1ef   : > { %886 = shalt.err (!%p883_p1)
}
 0x1f0   : > { %s887_s26 = scalar_lea.hbm %s1232_s7, 256  ;;  %s891_s28 = scalar_lea.hbm %s1284_s5, 512 }
 0x1f1   : > { %p888_p13 = scmp.ne.s32.totalorder %s1232_s7, %s887_s26  ;;  %p892_p4 = scmp.lt.u32.totalorder %s1232_s7, %s1284_s5 }
 0x1f2   : > { %p893_p5 = scmp.lt.u32.totalorder %s891_s28, %s887_s26  ;;  %p895_p11 = scmp.lt.u32.totalorder %s887_s26, %s1232_s7 }
 0x1f3   : > { %p889_p6 = pnand %p888_p13, %p1298_p0 }
 0x1f4   : > { %p894_p8 = por %p893_p5, %p892_p4 }
 0x1f5   : > { %p890_p10 = pneg %p889_p6 }
 0x1f6   : > { %p896_p2 = por %p895_p11, %p894_p8 }
 0x1f8   : > { %p897_p3 = pnand %p896_p2, %p890_p10 }
 0x1fa   : > { %900 = shalt.err (!%p897_p3)
}
 0x1fb   : > { %s954_s11 = smov 128  }
 0x1fc   : > { %724 = dma.vmem_to_hbm [thread:$0]  (%p1298_p0), %s1234_s30, 256, %s1232_s7, %s539_s22, %s954_s11, %s954_s11, %s952_s16  }
 0x1fd PF: > { %s567_s17 = sand.u32 1, %s931_s18   ;;  %p1299_p7 = scmp.ne.s32.totalorder %s1289_s25, 0 }
 0x1fe   : > { %p1300_p9 = scmp.ge.s32.totalorder %s943_s21, 2  ;;  %s568_s6 = scalar_lea.sflag [#allocation5], %s567_s17 }
 0x200   : > { %p738_p12 = pnand %p1300_p9, %p1299_p7 }
 0x202   : > { %926 = dma.done.wait (!%p738_p12), %s568_s6, 256  }
 0x203   : > { %928 = vsyncadd (!%p738_p12), %s568_s6, 4294967040  ;;  %p19_p1 = scmp.ge.s32.totalorder %s1101_s29, 4   ;;  %s1301_s18 = smov %s935_s19 }
 0x204   : > { %s1302_s19 = smov %s939_s20  ;;  %s1303_s20 = smov %s1117_s27 }
 0x205   : > { %s1304_s21 = smov %s1101_s29  ;;  %21 = sbr.rel (!%p19_p1) target bundleno = 6 (0x6), region = 93 }
 0x20c   :  { %573 = vsyncpa [#allocation4], 1 }
 0x20d   :  { %575 = vsyncpa [#allocation4 + $0x1], 1 }
 0x20e   :  { %576 = vsyncpa [#allocation7], 1 }
 0x20f   :  { %577 = vsyncpa [#allocation5], 1 }
 0x210   :  { %579 = vsyncpa [#allocation5 + $0x1], 1 }

</bundles_post_ra>
